<compile_context>
chip_gen: v7x
topology: tpu7x:2x2x1
jax: 0.10.0
libtpu: 0.0.40
codegen_flags: <defaults>
</compile_context>

<pallas_src>
import functools

import jax
import jax.numpy as jnp
from jax.experimental import pallas as pl
from jax.experimental.pallas import tpu as pltpu

_BN_EPS = 1e-5
EXPANSION = 4


def _round_up(x, m):
    return (x + m - 1) // m * m


# --------------------------------------------------------------------------
# Generic tiled matmul kernel: bf16 x bf16 -> f32 acc, bias (+residual) (+ReLU)
# --------------------------------------------------------------------------

def _mm_kernel(a_ref, b_ref, bias_ref, *rest, relu, residual):
    if residual:
        res_ref, o_ref, acc_ref = rest
    else:
        o_ref, acc_ref = rest

    @pl.when(pl.program_id(2) == 0)
    def _():
        acc_ref[...] = jnp.zeros_like(acc_ref)

    acc_ref[...] += jnp.dot(a_ref[...], b_ref[...],
                            preferred_element_type=jnp.float32)

    @pl.when(pl.program_id(2) == pl.num_programs(2) - 1)
    def _():
        r = acc_ref[...] + bias_ref[...]
        if residual:
            r = r + res_ref[...].astype(jnp.float32)
        if relu:
            r = jnp.maximum(r, 0.0)
        o_ref[...] = r.astype(o_ref.dtype)


def _pick_tm(m):
    if m >= 512:
        return 256
    if m >= 128:
        return 128
    return _round_up(m, 8)


def _pick_tk(k):
    for t in (512, 384, 256, 128):
        if k % t == 0:
            return t
    return k  # fall back: full-K block (only hit for non-128-multiple K)


@functools.partial(jax.jit, static_argnames=("relu", "out_dtype"))
def matmul_bias_act(a, b, bias, residual=None, *, relu=False, out_dtype=jnp.bfloat16):
    """out = act(a @ b + bias [+ residual]).

    a: (M, Ka) any float; b: (Kb, Np) bf16, pre-padded so Kb, Np are multiples of 128;
    bias: (1, Np) f32; residual: optional (M, Np) bf16 fused into the epilogue.
    """
    M, Ka = a.shape
    Kb, Np = b.shape
    a = a.astype(jnp.bfloat16)
    if Ka < Kb:                                   # only the 7x7 stem hits this (147 -> 256)
        a = jnp.pad(a, ((0, 0), (0, Kb - Ka)))
    TM = _pick_tm(M)
    Mp = _round_up(M, TM)
    if Mp > M:
        a = jnp.pad(a, ((0, Mp - M), (0, 0)))
        if residual is not None:
            residual = jnp.pad(residual, ((0, Mp - M), (0, 0)))
    TN = 256 if (Np % 256 == 0) else 128
    TK = _pick_tk(Kb)

    has_res = residual is not None
    in_specs = [
        pl.BlockSpec((TM, TK), lambda i, j, k: (i, k)),
        pl.BlockSpec((TK, TN), lambda i, j, k: (k, j)),
        pl.BlockSpec((1, TN), lambda i, j, k: (0, j)),
    ]
    inputs = [a, b, bias]
    if has_res:
        in_specs.append(pl.BlockSpec((TM, TN), lambda i, j, k: (i, j)))
        inputs.append(residual.astype(jnp.bfloat16))

    out = pl.pallas_call(
        functools.partial(_mm_kernel, relu=relu, residual=has_res),
        out_shape=jax.ShapeDtypeStruct((Mp, Np), out_dtype),
        grid=(Mp // TM, Np // TN, Kb // TK),
        in_specs=in_specs,
        out_specs=pl.BlockSpec((TM, TN), lambda i, j, k: (i, j)),
        scratch_shapes=[pltpu.VMEM((TM, TN), jnp.float32)],
        compiler_params=pltpu.CompilerParams(
            dimension_semantics=("parallel", "parallel", "arbitrary")),
    )(*inputs)
    if Mp > M:
        out = out[:M]
    return out


# --------------------------------------------------------------------------
# Implicit-im2col 3x3 stride-1 conv kernel (manual DMA of 9 row-shifted slabs)
# --------------------------------------------------------------------------

def _conv3x3s1_kernel(x_hbm, w_ref, bias_ref, o_ref, abuf, acc_ref, sem, *, tm, taps):
    n = pl.program_id(0)
    m0 = pl.multiple_of(pl.program_id(1) * tm, 8)
    # Kick off all 9 shifted-row DMAs up front; compute overlaps the remaining transfers.
    for t, s in enumerate(taps):
        pltpu.make_async_copy(x_hbm.at[n, pl.ds(m0 + s, tm), :],
                              abuf.at[t], sem.at[t]).start()
    for t, s in enumerate(taps):
        pltpu.make_async_copy(x_hbm.at[n, pl.ds(m0 + s, tm), :],
                              abuf.at[t], sem.at[t]).wait()
        contrib = jnp.dot(abuf[t], w_ref[t], preferred_element_type=jnp.float32)
        if t == 0:
            acc_ref[...] = contrib
        else:
            acc_ref[...] += contrib
    r = acc_ref[...] + bias_ref[...]
    o_ref[0] = jnp.maximum(r, 0.0).astype(o_ref.dtype)   # conv2 always has fused ReLU


@jax.jit
def conv3x3_s1(x, w9, bias):
    """3x3 conv, stride 1, pad 1, fused BN bias + ReLU.

    x: (N, H, W, Cin_p) bf16; w9: (9, Cin_p, Cout_p) bf16; bias: (1, Cout_p) f32.
    Works on the per-image flattened padded activation: tap (di, dj) is a pure row shift
    of di*Wp + dj, so each tap's operand is a contiguous (TM, Cin) slab DMA'd from HBM.
    Columns wo in {W, W+1} of each output row are wrap-around garbage and are sliced off.
    """
    N, H, W, C = x.shape
    cout = w9.shape[2]
    Wp = W + 2
    M = H * Wp                       # flat output rows computed per image
    if M >= 1024:
        TM = 256
    elif M >= 128:
        TM = 128
    else:
        TM = _round_up(M, 8)
    Mp = _round_up(M, TM)
    smax = 2 * Wp + 2
    Hp = -(-(Mp + smax) // Wp)       # enough padded rows that every shifted DMA stays in-bounds
    xp = jnp.pad(x, ((0, 0), (1, Hp - H - 1), (1, 1), (0, 0)))
    xf = xp.reshape(N, Hp * Wp, C)
    TN = 256 if (cout % 256 == 0) else 128
    taps = tuple(di * Wp + dj for di in range(3) for dj in range(3))

    out = pl.pallas_call(
        functools.partial(_conv3x3s1_kernel, tm=TM, taps=taps),
        out_shape=jax.ShapeDtypeStruct((N, Mp, cout), jnp.bfloat16),
        grid=(N, Mp // TM, cout // TN),
        in_specs=[
            pl.BlockSpec(memory_space=pl.ANY),                     # padded activation stays in HBM
            pl.BlockSpec((9, C, TN), lambda n, i, j: (0, 0, j)),   # all 9 weight taps for this j
            pl.BlockSpec((1, TN), lambda n, i, j: (0, j)),
        ],
        out_specs=pl.BlockSpec((1, TM, TN), lambda n, i, j: (n, i, j)),
        scratch_shapes=[
            pltpu.VMEM((9, TM, C), jnp.bfloat16),   # 9 row-shifted activation slabs
            pltpu.VMEM((TM, TN), jnp.float32),      # f32 accumulator
            pltpu.SemaphoreType.DMA((9,)),
        ],
        compiler_params=pltpu.CompilerParams(
            dimension_semantics=("parallel", "parallel", "parallel")),
    )(xf, w9, bias)
    out = out[:, :M, :].reshape(N, H, Wp, cout)[:, :, :W, :]
    return out


# --------------------------------------------------------------------------
# XLA-side glue: explicit im2col (stem 7x7 + the two stride-2 3x3s only), maxpool
# --------------------------------------------------------------------------

def _im2col(x, kh, kw, stride, pad):
    """x NHWC -> (N*Ho*Wo, kh*kw*C) patches; row order (kh, kw, Cin)."""
    N, H, W, C = x.shape
    xp = jnp.pad(x, ((0, 0), (pad, pad), (pad, pad), (0, 0)))
    Ho = (H + 2 * pad - kh) // stride + 1
    Wo = (W + 2 * pad - kw) // stride + 1
    cols = []
    for i in range(kh):
        for j in range(kw):
            cols.append(xp[:, i:i + stride * (Ho - 1) + 1:stride,
                            j:j + stride * (Wo - 1) + 1:stride, :])
    patches = jnp.stack(cols, axis=3)
    return patches.reshape(N * Ho * Wo, kh * kw * C), (N, Ho, Wo)


def conv_im2col(x, p, *, stride, pad, relu):
    patches, (N, Ho, Wo) = _im2col(x, p["kh"], p["kw"], stride, pad)
    y = matmul_bias_act(patches, p["w"], p["b"], relu=relu)
    return y.reshape(N, Ho, Wo, p["w"].shape[1])


def conv1x1(x, p, *, stride=1, relu=False, residual=None):
    if stride > 1:
        x = x[:, ::stride, ::stride, :]
    N, H, W, C = x.shape
    y = matmul_bias_act(x.reshape(N * H * W, C), p["w"], p["b"],
                        residual=residual, relu=relu)
    return y.reshape(N, H, W, p["w"].shape[1])


def max_pool_3x3_s2_p1(x):
    """MaxPool2d(3, stride=2, padding=1) as a pairwise max over 9 strided slices.
    Kept in XLA (fuses into one VPU pass) to avoid writing a 9x-duplicated stack to HBM."""
    N, H, W, C = x.shape
    xp = jnp.pad(x, ((0, 0), (1, 1), (1, 1), (0, 0)), constant_values=-jnp.inf)
    Ho = (H + 2 - 3) // 2 + 1
    Wo = (W + 2 - 3) // 2 + 1
    out = None
    for i in range(3):
        for j in range(3):
            win = xp[:, i:i + 2 * (Ho - 1) + 1:2, j:j + 2 * (Wo - 1) + 1:2, :]
            out = win if out is None else jnp.maximum(out, win)
    return out


# --------------------------------------------------------------------------
# Deterministic synthetic parameters (BN folded, weights pre-padded / bf16)
# --------------------------------------------------------------------------

def _conv_w(key, cout, cin, kh, kw):
    fan_in = cin * kh * kw
    return jax.random.normal(key, (cout, cin, kh, kw), jnp.float32) / jnp.sqrt(float(fan_in))


def _bn_params(key, c):
    k1, k2, k3, k4 = jax.random.split(key, 4)
    gamma = 1.0 + 0.1 * jax.random.normal(k1, (c,), jnp.float32)
    beta = 0.1 * jax.random.normal(k2, (c,), jnp.float32)
    mean = 0.1 * jax.random.normal(k3, (c,), jnp.float32)
    var = jax.random.uniform(k4, (c,), jnp.float32, minval=0.5, maxval=1.5)
    return gamma, beta, mean, var


def _conv_bn(key, cout, cin, kh, kw):
    kconv, kbn = jax.random.split(key)
    w = _conv_w(kconv, cout, cin, kh, kw)
    gamma, beta, mean, var = _bn_params(kbn, cout)
    scale = gamma / jnp.sqrt(var + _BN_EPS)
    return w * scale[:, None, None, None], beta - mean * scale


def _pad_bias(b, cout_p):
    return jnp.pad(b, (0, cout_p - b.shape[0])).reshape(1, cout_p).astype(jnp.float32)


def _prep_1x1(w, b):
    cout, cin = w.shape[0], w.shape[1]
    cin_p, cout_p = _round_up(cin, 128), _round_up(cout, 128)
    wm = jnp.transpose(w.reshape(cout, cin), (1, 0))
    wm = jnp.pad(wm, ((0, cin_p - cin), (0, cout_p - cout))).astype(jnp.bfloat16)
    return {"w": wm, "b": _pad_bias(b, cout_p)}


def _prep_3x3_s1(w, b):
    cout, cin = w.shape[0], w.shape[1]
    cin_p, cout_p = _round_up(cin, 128), _round_up(cout, 128)
    w9 = jnp.transpose(w, (2, 3, 1, 0)).reshape(9, cin, cout)
    w9 = jnp.pad(w9, ((0, 0), (0, cin_p - cin), (0, cout_p - cout))).astype(jnp.bfloat16)
    return {"w9": w9, "b": _pad_bias(b, cout_p)}


def _prep_im2col(w, b):
    cout, cin, kh, kw = w.shape
    cout_p = _round_up(cout, 128)
    K = kh * kw * cin
    Kp = _round_up(K, 128)
    wm = jnp.transpose(w, (2, 3, 1, 0)).reshape(K, cout)
    wm = jnp.pad(wm, ((0, Kp - K), (0, cout_p - cout))).astype(jnp.bfloat16)
    return {"w": wm, "b": _pad_bias(b, cout_p), "kh": kh, "kw": kw}


def make_bottleneck_params(key, inplanes, planes, stride):
    keys = jax.random.split(key, 4)
    w1, b1 = _conv_bn(keys[0], planes, inplanes, 1, 1)
    w2, b2 = _conv_bn(keys[1], planes, planes, 3, 3)
    w3, b3 = _conv_bn(keys[2], planes * EXPANSION, planes, 1, 1)
    p = {"stride": stride,
         "conv1": _prep_1x1(w1, b1),
         "conv2": _prep_3x3_s1(w2, b2) if stride == 1 else _prep_im2col(w2, b2),
         "conv3": _prep_1x1(w3, b3)}
    if stride != 1 or inplanes != planes * EXPANSION:
        wd, bd = _conv_bn(keys[3], planes * EXPANSION, inplanes, 1, 1)
        p["down"] = _prep_1x1(wd, bd)
    return p


def make_resnet_cam_params(key, n_classes=20, layers=(3, 4, 6, 3), strides=(2, 2, 2, 1)):
    keys = jax.random.split(key, 6)
    ws, bs = _conv_bn(keys[0], 64, 3, 7, 7)
    params = {"stem": _prep_im2col(ws, bs), "stem_stride": strides[0]}
    inplanes = 64
    widths = (64, 128, 256, 512)
    layer_strides = (1, strides[1], strides[2], strides[3])
    for li in range(4):
        bkeys = jax.random.split(keys[1 + li], layers[li])
        blocks = []
        for bi in range(layers[li]):
            s = layer_strides[li] if bi == 0 else 1
            blocks.append(make_bottleneck_params(bkeys[bi], inplanes, widths[li], s))
            inplanes = widths[li] * EXPANSION
        params[f"layer{li + 1}"] = blocks
    # classifier: nn.Conv2d(2048, n_classes, 1, bias=False); class dim pre-padded to 128.
    ncp = _round_up(n_classes, 128)
    cw = jax.random.normal(keys[5], (n_classes, 2048), jnp.float32) / jnp.sqrt(2048.0)
    params["classifier_w"] = jnp.pad(cw.T, ((0, 0), (0, ncp - n_classes))).astype(jnp.bfloat16)
    params["classifier_b"] = jnp.zeros((1, ncp), jnp.float32)
    return params


# --------------------------------------------------------------------------
# Forward pass (== ResNet.forward of net/resnet_cam.py)
# --------------------------------------------------------------------------

def bottleneck_forward(x, p):
    stride = p["stride"]
    out = conv1x1(x, p["conv1"], relu=True)
    if stride == 1:
        out = conv3x3_s1(out, p["conv2"]["w9"], p["conv2"]["b"])
    else:
        out = conv_im2col(out, p["conv2"], stride=stride, pad=1, relu=True)
    if "down" in p:
        identity = conv1x1(x, p["down"], stride=stride, relu=False)
    else:
        identity = x
    N, H, W, _ = out.shape
    cout = p["conv3"]["w"].shape[1]
    # conv3 + BN + residual add + ReLU, all fused into one matmul epilogue.
    return conv1x1(out, p["conv3"], relu=True,
                   residual=identity.reshape(N * H * W, cout))


def resnet_cam_forward(params, x_nchw, n_classes=20):
    x = jnp.transpose(x_nchw, (0, 2, 3, 1)).astype(jnp.bfloat16)   # NCHW -> NHWC bf16

    # stem: conv7x7/s2 + BN + ReLU (Pallas matmul) + maxpool3x3/s2
    x0 = conv_im2col(x, params["stem"], stride=params["stem_stride"], pad=3, relu=True)
    x0 = max_pool_3x3_s2_p1(x0)

    x1 = x0
    for p in params["layer1"]:
        x1 = bottleneck_forward(x1, p)
    x1 = jax.lax.stop_gradient(x1)      # matches .detach() in the PyTorch forward

    x2 = x1
    for p in params["layer2"]:
        x2 = bottleneck_forward(x2, p)
    x3 = x2
    for p in params["layer3"]:
        x3 = bottleneck_forward(x3, p)
    x4 = x3
    for p in params["layer4"]:
        x4 = bottleneck_forward(x4, p)

    # Single classifier matmul: GAP commutes with the bias-free 1x1 conv, so
    # out = mean_spatial(z) and cam = relu(z) with z = x4 @ W (class dim stays lane-dense=128).
    N, H, W, C = x4.shape
    z = matmul_bias_act(x4.reshape(N * H * W, C), params["classifier_w"],
                        params["classifier_b"], relu=False, out_dtype=jnp.float32)
    ncp = z.shape[1]
    out = jnp.mean(z.reshape(N, H * W, ncp), axis=1)[:, :n_classes]
    cam = jnp.maximum(z, 0.0).reshape(N, H, W, ncp)[..., :n_classes]
    cam = jnp.transpose(cam, (0, 3, 1, 2))                          # NCHW
    return out, cam


if __name__ == "__main__":
    key = jax.random.PRNGKey(0)
    pkey, xkey = jax.random.split(key)

    params = make_resnet_cam_params(pkey, n_classes=20)
    x = jax.random.normal(xkey, (2, 3, 64, 64), jnp.float32)

    out, cam = resnet_cam_forward(params, x, n_classes=20)
    out, cam = jax.block_until_ready((out, cam))

    assert out.shape == (2, 20), out.shape
    assert cam.shape == (2, 20, 4, 4), cam.shape   # total stride 16 (strides=(2,2,2,1))
    assert bool(jnp.all(jnp.isfinite(out))) and bool(jnp.all(cam >= 0.0))
    print("KERNEL_OK")
</pallas_src>

<mosaic_0001>
module attributes {stable_mosaic.version = 11 : i64} {
  func.func @_mm_kernel(%arg0: i32, %arg1: i32, %arg2: i32, %arg3: memref<256x256xbf16, #tpu.memory_space<vmem>>, %arg4: memref<256x128xbf16, #tpu.memory_space<vmem>>, %arg5: memref<1x128xf32, #tpu.memory_space<vmem>>, %arg6: memref<256x128xbf16, #tpu.memory_space<vmem>>, %arg7: memref<256x128xf32, #tpu.memory_space<vmem>>) attributes {dimension_semantics = [#tpu.dimension_semantics<parallel>, #tpu.dimension_semantics<parallel>, #tpu.dimension_semantics<arbitrary>], iteration_bounds = array<i64: 8, 1, 1>, scalar_prefetch = 0 : i64, scratch_operands = 1 : i64, tpu.core_type = #tpu.core_type<tc>, window_params = [{transform_indices = @transform_0, window_bounds = array<i64: 256, 256>}, {transform_indices = @transform_1, window_bounds = array<i64: 256, 128>}, {transform_indices = @transform_2, window_bounds = array<i64: 1, 128>}, {transform_indices = @transform_3, window_bounds = array<i64: 256, 128>}]} {
    %c0_i32 = arith.constant 0 : i32
    %0 = arith.cmpi eq, %arg2, %c0_i32 : i32
    %1 = arith.extui %0 : i1 to i32
    %c0_i32_0 = arith.constant 0 : i32
    %2 = arith.cmpi ne, %1, %c0_i32_0 : i32
    scf.if %2 {
      %cst_10 = arith.constant 0.000000e+00 : f32
      %12 = vector.broadcast %cst_10 : f32 to vector<256x128xf32>
      %c0_11 = arith.constant 0 : index
      %c0_12 = arith.constant 0 : index
      %13 = vector.load %arg7[%c0_11, %c0_12] : memref<256x128xf32, #tpu.memory_space<vmem>>, vector<256x128xf32>
      tpu.vector_store %arg7[%c0_11, %c0_12], %12 {strides = array<i32>} : memref<256x128xf32, #tpu.memory_space<vmem>>, vector<256x128xf32>,
    } else {
    }
    %c0 = arith.constant 0 : index
    %c0_1 = arith.constant 0 : index
    %3 = vector.load %arg7[%c0, %c0_1] : memref<256x128xf32, #tpu.memory_space<vmem>>, vector<256x128xf32>
    %c0_2 = arith.constant 0 : index
    %c0_3 = arith.constant 0 : index
    %4 = vector.load %arg3[%c0_2, %c0_3] : memref<256x256xbf16, #tpu.memory_space<vmem>>, vector<256x256xbf16>
    %c0_4 = arith.constant 0 : index
    %c0_5 = arith.constant 0 : index
    %5 = vector.load %arg4[%c0_4, %c0_5] : memref<256x128xbf16, #tpu.memory_space<vmem>>, vector<256x128xbf16>
    %cst = arith.constant dense<0.000000e+00> : vector<256x128xf32>
    %6 = tpu.matmul %4, %5, %cst {dimension_numbers = #tpu.dot_dimension_numbers<[1], [0], [0], [1], [0, 0, 1, 1], [], []>} : vector<256x256xbf16>, vector<256x128xbf16>, vector<256x128xf32> -> vector<256x128xf32>
    %7 = arith.addf %3, %6 : vector<256x128xf32>
    %c0_6 = arith.constant 0 : index
    %c0_7 = arith.constant 0 : index
    %8 = vector.load %arg7[%c0_6, %c0_7] : memref<256x128xf32, #tpu.memory_space<vmem>>, vector<256x128xf32>
    tpu.vector_store %arg7[%c0_6, %c0_7], %7 {strides = array<i32>} : memref<256x128xf32, #tpu.memory_space<vmem>>, vector<256x128xf32>,
    %c0_i32_8 = arith.constant 0 : i32
    %9 = arith.cmpi eq, %arg2, %c0_i32_8 : i32
    %10 = arith.extui %9 : i1 to i32
    %c0_i32_9 = arith.constant 0 : i32
    %11 = arith.cmpi ne, %10, %c0_i32_9 : i32
    scf.if %11 {
      %c0_10 = arith.constant 0 : index
      %c0_11 = arith.constant 0 : index
      %12 = vector.load %arg7[%c0_10, %c0_11] : memref<256x128xf32, #tpu.memory_space<vmem>>, vector<256x128xf32>
      %c0_12 = arith.constant 0 : index
      %c0_13 = arith.constant 0 : index
      %13 = vector.load %arg5[%c0_12, %c0_13] : memref<1x128xf32, #tpu.memory_space<vmem>>, vector<1x128xf32>
      %14 = vector.broadcast %13 : vector<1x128xf32> to vector<256x128xf32>
      %15 = arith.addf %12, %14 : vector<256x128xf32>
      %cst_14 = arith.constant 0.000000e+00 : f32
      %16 = vector.broadcast %cst_14 : f32 to vector<256x128xf32>
      %17 = arith.maximumf %15, %16 : vector<256x128xf32>
      %18 = arith.truncf %17 : vector<256x128xf32> to vector<256x128xbf16>
      %c0_15 = arith.constant 0 : index
      %c0_16 = arith.constant 0 : index
      %19 = vector.load %arg6[%c0_15, %c0_16] : memref<256x128xbf16, #tpu.memory_space<vmem>>, vector<256x128xbf16>
      tpu.vector_store %arg6[%c0_15, %c0_16], %18 {strides = array<i32>} : memref<256x128xbf16, #tpu.memory_space<vmem>>, vector<256x128xbf16>,
    } else {
    }
    return
  }
  func.func @transform_0(%arg0: i32, %arg1: i32, %arg2: i32) -> (i32, i32) {
    %c0_i32 = arith.constant 0 : i32
    return %arg0, %arg2 : i32, i32
  }
  func.func @transform_1(%arg0: i32, %arg1: i32, %arg2: i32) -> (i32, i32) {
    %c0_i32 = arith.constant 0 : i32
    return %arg2, %arg1 : i32, i32
  }
  func.func @transform_2(%arg0: i32, %arg1: i32, %arg2: i32) -> (i32, i32) {
    %c0_i32 = arith.constant 0 : i32
    %c0_i32_0 = arith.constant 0 : i32
    return %c0_i32, %arg1 : i32, i32
  }
  func.func @transform_3(%arg0: i32, %arg1: i32, %arg2: i32) -> (i32, i32) {
    %c0_i32 = arith.constant 0 : i32
    return %arg0, %arg1 : i32, i32
  }
}

</mosaic_0001>

<bundles_post_ra>
// kernel: matmul_bias_act.1
= control target key start
LH: loop header
LB: loop body
LE: loop exit
PB: predicated region body
PF: predicated region fallthrough
CT: control target
= control target key end

     0   :  { %8 = vsyncpa [#allocation4], 0  ;;  %s2099_s0 = inlined_call_operand.vmem [shape: bf16[2048,256], index: 0, kind: input, shape index: {}]   ;;  %s2100_s1 = inlined_call_operand.vmem [shape: bf16[256,128], index: 1, kind: input, shape index: {}]   ;;  %s2101_s2 = inlined_call_operand.vmem [shape: f32[1,128], index: 2, kind: input, shape index: {}]   ;;  %s2102_s3 = inlined_call_operand.hbm [shape: bf16[2048,128], index: 3, kind: output, shape index: {}]  }
   0x1   :  { %10 = vsyncpa [#allocation4 + $0x1], 0  ;;  %s1843_s12 = smov 0   ;;  %s1845_s13 = smov 0  }
   0x2   :  { %s1847_s14 = smov 0   ;;  %s1849_s15 = smov 0  }
   0x3   :  { %s1851_s16 = smov 0   ;;  %s1853_s17 = smov 0  }
   0x4 LB: > { %s1265_s18 = sadd.s32 4294967295, %s1818_s17   ;;  %s1266_s19 = sadd.s32 4294967294, %s1818_s17   ;;  %s1818_s17 = sphi %s1853_s17, %s16_s17   ;;  %s1814_s16 = sphi %s1851_s16, %s2109_s16   ;;  %s1810_s15 = sphi %s1849_s15, %s2108_s15   ;;  %s1806_s14 = sphi %s1847_s14, %s2107_s14   ;;  %s1802_s13 = sphi %s1845_s13, %s2106_s13   ;;  %s1798_s12 = sphi %s1843_s12, %s2105_s12  }
   0x5   : > { %s35_s20 = sadd.s32 1, %s1814_s16  ;;  %s126_s21 = sadd.s32 1, %s1806_s14 }
   0x6   : > { %p37_p0 = scmp.ge.s32.totalorder %s35_s20, 8  ;;  %p136_p1 = scmp.ne.s32.totalorder %s1806_s14, %s1802_s13 }
   0x7   : > { %p137_p2 = scmp.eq.s32.totalorder %s1265_s18, 7  ;;  %p142_p3 = scmp.ne.s32.totalorder %s1802_s13, %s1798_s12 }
   0x8   : > { %s2111_s20 = smov (%p37_p0, %s35_s20), 0  ;;  %p143_p5 = scmp.eq.s32.totalorder %s1266_s19, 7 }
   0x9   : > { %p1883_p4 = por %p137_p2, %p136_p1  ;;  %s121_s23 = ssub.s32 %s1814_s16, %s2111_s20 }
   0xa   : > { %p1271_p6 = scmp.ge.s32.totalorder %s1818_s17, 1  ;;  %p124_p7 = scmp.eq.s32.totalorder %s121_s23, 0 }
   0xb   : > { %p1890_p8 = por %p143_p5, %p142_p3  ;;  %p194_p9 = scmp.lt.s32.totalorder %s1818_s17, 9 }
   0xc   : > { %s1896_s25 = scalar_select %p124_p7, %s1806_s14, %s126_s21  }
   0xd   : > { %p195_p10 = pnand %p1271_p6, %p194_p9 }
   0xe   : > { %v1676_v0 = vld [vmem:[%s2100_s1 + $0x40] sm:$0xff] (!%p195_p10)   ;;  %s1273_s28 = sshll.u32 (!%p195_p10), %s1810_s15, 5  ;;  %v1678_v2 = vld [vmem:[%s2100_s1 + $0x48] sm:$0xff] (!%p195_p10)   ;;  %v1680_v4 = vld [vmem:[%s2100_s1 + $0x50] sm:$0xff] (!%p195_p10)   ;;  %s231_s6 = sand.u32 (!%p195_p10), 1, %s1802_s13  }
   0xf   : > { %198 = sbr.rel (%p195_p10) target bundleno = 342 (0x156), region = 32  ;;  %v1677_v1 = vld [vmem:[%s2100_s1] sm:$0xff] (!%p195_p10)   ;;  %1491 = vmatprep.subr.bf16.mxu0 (!%p195_p10), %v1676_v0  ;;  %1603 = vmatprep.subr.bf16.mxu1 (!%p195_p10), %v1676_v0  ;;  %v1679_v3 = vld [vmem:[%s2100_s1 + $0x8] sm:$0xff] (!%p195_p10)   ;;  %p236_p11 = scmp.lt.s32.totalorder (!%p195_p10), %s1273_s28, 255  ;;  %v1681_v5 = vld [vmem:[%s2100_s1 + $0x10] sm:$0xff] (!%p195_p10)  }
  0x10   : > { %1492 = vmatpush3.bf16.msra.mxu0 (!%p195_p10), %v1677_v1  ;;  %1611 = vmatpush3.bf16.msra.mxu1 (!%p195_p10), %v1677_v1  ;;  %v1682_v6 = vld [vmem:[%s2100_s1 + $0x58] sm:$0xff] (!%p195_p10)   ;;  %v1684_v8 = vld [vmem:[%s2100_s1 + $0x60] sm:$0xff] (!%p195_p10)   ;;  %v1686_v10 = vld [vmem:[%s2100_s1 + $0x68] sm:$0xff] (!%p195_p10)   ;;  %s1820_s19 = smov (!%p195_p10), [#allocation3]  }
  0x11   : > { %1493 = vmatprep.subr.bf16.mxu0 (!%p195_p10), %v1678_v2  ;;  %1604 = vmatprep.subr.bf16.mxu1 (!%p195_p10), %v1678_v2  ;;  %v1683_v7 = vld [vmem:[%s2100_s1 + $0x18] sm:$0xff] (!%p195_p10)   ;;  %v1685_v9 = vld [vmem:[%s2100_s1 + $0x20] sm:$0xff] (!%p195_p10)   ;;  %v1687_v13 = vld [vmem:[%s2100_s1 + $0x28] sm:$0xff] (!%p195_p10)   ;;  %s1744_s21 = sshll.u32 (!%p195_p10), %s1820_s19, 4  ;;  %s1745_s21 = int_to_ptr.vmem [resolvable:$false] %s1744_s21 }
  0x12   : > { %v1688_v14 = vld [vmem:[%s2100_s1 + $0x70] sm:$0xff] (!%p195_p10)   ;;  %v1690_v16 = vld [vmem:[%s2100_s1 + $0x78] sm:$0xff] (!%p195_p10)   ;;  %v1987_v51 = vld [vmem:[%s2101_s2] ss:$0 sm:$0xff] (!%p195_p10)  ;;  %s1746_s23 = scalar_lea.vmem (!%p195_p10), %s1745_s21, 4096 }
  0x13   : > { %v1689_v15 = vld [vmem:[%s2100_s1 + $0x30] sm:$0xff] (!%p195_p10)   ;;  %v1691_v17 = vld [vmem:[%s2100_s1 + $0x38] sm:$0xff] (!%p195_p10)  }
  0x14   : > { %1494 = vmatpush3.bf16.msra.mxu0 (!%p195_p10), %v1679_v3  ;;  %1612 = vmatpush3.bf16.msra.mxu1 (!%p195_p10), %v1679_v3 }
  0x15   : > { %1495 = vmatprep.subr.bf16.mxu0 (!%p195_p10), %v1680_v4  ;;  %1605 = vmatprep.subr.bf16.mxu1 (!%p195_p10), %v1680_v4 }
  0x16   : > { %s2113_s28 = smov (!%p236_p11, %s1273_s28), 255 }
  0x17   : > { %s1362_s26 = sshll.u32 %s2113_s28, 3  ;;  %s1395_s28 = sshll.u32 %s1810_s15, 11 }
  0x18   : > { %1496 = vmatpush3.bf16.msra.mxu0 %v1681_v5  ;;  %1613 = vmatpush3.bf16.msra.mxu1 %v1681_v5  ;;  %s1929_s5 = scalar_lea.vmem %s2099_s0, %s1362_s26  ;;  %s2045_s11 = scalar_lea.hbm %s2102_s3, %s1395_s28 }
  0x19   : > { %1497 = vmatprep.subr.bf16.mxu0 %v1682_v6  ;;  %1606 = vmatprep.subr.bf16.mxu1 %v1682_v6  ;;  %v1694_v11 = vld [vmem:[%s1929_s5 + $0x4] ss:$8 sps:$4 sm:$0xff]   ;;  %v1692_v18 = vld [vmem:[%s1929_s5] ss:$8 sps:$4 sm:$0xff]   ;;  %v1698_v20 = vld [vmem:[%s1929_s5 + $0x14] ss:$8 sps:$4 sm:$0xff]  }
  0x1a   : > { %v1697_v12 = vld [vmem:[%s1929_s5 + $0x84] ss:$8 sps:$4 sm:$0xff]   ;;  %680 = vmatprep.mubr.bf16.mxu0 %v1694_v11  ;;  %v1695_v19 = vld [vmem:[%s1929_s5 + $0x80] ss:$8 sps:$4 sm:$0xff]   ;;  %v1700_v21 = vld [vmem:[%s1929_s5 + $0x94] ss:$8 sps:$4 sm:$0xff]  }
  0x1b   : > { %744 = vmatprep.mubr.bf16.mxu1 %v1697_v12  ;;  %v1702_v22 = vld [vmem:[%s1929_s5 + $0x10] ss:$8 sps:$4 sm:$0xff]   ;;  %v1704_v24 = vld [vmem:[%s1929_s5 + $0x24] ss:$8 sps:$4 sm:$0xff]   ;;  %v1708_v26 = vld [vmem:[%s1929_s5 + $0x20] ss:$8 sps:$4 sm:$0xff]  }
  0x1c   : > { %1498 = vmatpush3.bf16.msra.mxu0 %v1683_v7  ;;  %1614 = vmatpush3.bf16.msra.mxu1 %v1683_v7  ;;  %v1703_v23 = vld [vmem:[%s1929_s5 + $0x90] ss:$8 sps:$4 sm:$0xff]   ;;  %v1706_v25 = vld [vmem:[%s1929_s5 + $0xa4] ss:$8 sps:$4 sm:$0xff]   ;;  %v1709_v27 = vld [vmem:[%s1929_s5 + $0xa0] ss:$8 sps:$4 sm:$0xff]  }
  0x1d   : > { %1499 = vmatprep.subr.bf16.mxu0 %v1684_v8  ;;  %1607 = vmatprep.subr.bf16.mxu1 %v1684_v8  ;;  %v1710_v28 = vld [vmem:[%s1929_s5 + $0x34] ss:$8 sps:$4 sm:$0xff]   ;;  %v1714_v30 = vld [vmem:[%s1929_s5 + $0x30] ss:$8 sps:$4 sm:$0xff]   ;;  %v1716_v32 = vld [vmem:[%s1929_s5 + $0x44] ss:$8 sps:$4 sm:$0xff]  }
  0x1e   : > { %v1712_v29 = vld [vmem:[%s1929_s5 + $0xb4] ss:$8 sps:$4 sm:$0xff]   ;;  %v1715_v31 = vld [vmem:[%s1929_s5 + $0xb0] ss:$8 sps:$4 sm:$0xff]   ;;  %v1718_v33 = vld [vmem:[%s1929_s5 + $0xc4] ss:$8 sps:$4 sm:$0xff]  }
  0x1f   : > { %v1720_v34 = vld [vmem:[%s1929_s5 + $0x40] ss:$8 sps:$4 sm:$0xff]   ;;  %v1722_v36 = vld [vmem:[%s1929_s5 + $0x54] ss:$8 sps:$4 sm:$0xff]   ;;  %v1726_v38 = vld [vmem:[%s1929_s5 + $0x50] ss:$8 sps:$4 sm:$0xff]  }
  0x20   : > { %1500 = vmatpush3.bf16.msra.mxu0 %v1685_v9  ;;  %1615 = vmatpush3.bf16.msra.mxu1 %v1685_v9  ;;  %v1721_v35 = vld [vmem:[%s1929_s5 + $0xc0] ss:$8 sps:$4 sm:$0xff]   ;;  %v1724_v37 = vld [vmem:[%s1929_s5 + $0xd4] ss:$8 sps:$4 sm:$0xff]   ;;  %v1727_v39 = vld [vmem:[%s1929_s5 + $0xd0] ss:$8 sps:$4 sm:$0xff]  }
  0x21   : > { %1501 = vmatprep.subr.bf16.mxu0 %v1686_v10  ;;  %1608 = vmatprep.subr.bf16.mxu1 %v1686_v10  ;;  %v1728_v40 = vld [vmem:[%s1929_s5 + $0x64] ss:$8 sps:$4 sm:$0xff]   ;;  %v1732_v42 = vld [vmem:[%s1929_s5 + $0x60] ss:$8 sps:$4 sm:$0xff]   ;;  %v1734_v44 = vld [vmem:[%s1929_s5 + $0x74] ss:$8 sps:$4 sm:$0xff]  }
  0x22   : > { %v1730_v41 = vld [vmem:[%s1929_s5 + $0xe4] ss:$8 sps:$4 sm:$0xff]   ;;  %v1733_v43 = vld [vmem:[%s1929_s5 + $0xe0] ss:$8 sps:$4 sm:$0xff]   ;;  %v1736_v45 = vld [vmem:[%s1929_s5 + $0xf4] ss:$8 sps:$4 sm:$0xff]  }
  0x23   : > { %v1738_v46 = vld [vmem:[%s1929_s5 + $0x70] ss:$8 sps:$4 sm:$0xff]   ;;  %s2053_s15 = scalar_lea.sflag [#allocation4], %s231_s6 }
  0x24   : > { %1502 = vmatpush3.bf16.msra.mxu0 %v1687_v13  ;;  %1616 = vmatpush3.bf16.msra.mxu1 %v1687_v13  ;;  %v1739_v47 = vld [vmem:[%s1929_s5 + $0xf0] ss:$8 sps:$4 sm:$0xff]   ;;  %s1272_s5 = sshll.u32 %s231_s6, 7 }
  0x25   : > { %1503 = vmatprep.subr.bf16.mxu0 %v1688_v14  ;;  %1609 = vmatprep.subr.bf16.mxu1 %v1688_v14  ;;  %s1996_s7 = scalar_lea.vmem [#allocation3], %s1272_s5 }
  0x26   : > { %s1154_s8 = sshll.u32 %s1996_s7, 4  ;;  %s2047_s8 = int_to_ptr.vmem [resolvable:$true] %s1154_s8 }
  0x27   : > { %s1740_s18 = scalar_lea.vmem %s2047_s8, 2048  ;;  %p1747_p1 = scmp.lt.s32.totalorder %s2047_s8, %s1745_s21 }
  0x28   : > { %1504 = vmatpush3.bf16.msra.mxu0 %v1689_v15  ;;  %1617 = vmatpush3.bf16.msra.mxu1 %v1689_v15  ;;  %p1741_p12 = scmp.ne.s32.totalorder %s2047_s8, %s1740_s18  ;;  %p1748_p2 = scmp.lt.s32.totalorder %s1746_s23, %s1740_s18 }
  0x29   : > { %1505 = vmatprep.subr.bf16.mxu0 %v1690_v16  ;;  %1610 = vmatprep.subr.bf16.mxu1 %v1690_v16 }
  0x2a   : > { %p1742_p13 = pnand %p1741_p12, %p1883_p4  ;;  %p1749_p3 = por %p1748_p2, %p1747_p1 }
  0x2c   : > { %1506 = vmatpush3.bf16.msra.mxu0 %v1691_v17  ;;  %1618 = vmatpush3.bf16.msra.mxu1 %v1691_v17  ;;  %p1743_p0 = pneg %p1742_p13 }
  0x2e   : > { %p1750_p5 = pnand %p1749_p3, %p1743_p0 }
  0x2f   : > { %681 = vmatmul.mubr.bf16.vlgmr.msra.gmra.mrb[0].mxu0 %v1692_v18  ;;  %745 = vmatmul.mubr.bf16.vlgmr.msra.gmra.mrb[0].mxu1 %v1695_v19 }
  0x30   : > { %688 = vmatprep.mubr.bf16.mxu0 %v1698_v20  ;;  %752 = vmatprep.mubr.bf16.mxu1 %v1700_v21 }
  0x37   : > { %689 = vmatmul.mubr.bf16.gmra.mrb[4].mxu0 %v1702_v22  ;;  %753 = vmatmul.mubr.bf16.gmra.mrb[4].mxu1 %v1703_v23 }
  0x38   : > { %696 = vmatprep.mubr.bf16.mxu0 %v1704_v24  ;;  %760 = vmatprep.mubr.bf16.mxu1 %v1706_v25 }
  0x3f   : > { %697 = vmatmul.mubr.bf16.gmra.mrb[8].mxu0 %v1708_v26  ;;  %761 = vmatmul.mubr.bf16.gmra.mrb[8].mxu1 %v1709_v27 }
  0x40   : > { %704 = vmatprep.mubr.bf16.mxu0 %v1710_v28  ;;  %768 = vmatprep.mubr.bf16.mxu1 %v1712_v29 }
  0x47   : > { %705 = vmatmul.mubr.bf16.gmra.mrb[12].mxu0 %v1714_v30  ;;  %769 = vmatmul.mubr.bf16.gmra.mrb[12].mxu1 %v1715_v31 }
  0x48   : > { %712 = vmatprep.mubr.bf16.mxu0 %v1716_v32  ;;  %776 = vmatprep.mubr.bf16.mxu1 %v1718_v33 }
  0x4f   : > { %713 = vmatmul.mubr.bf16.gmra.mrb[16].mxu0 %v1720_v34  ;;  %777 = vmatmul.mubr.bf16.gmra.mrb[16].mxu1 %v1721_v35 }
  0x50   : > { %720 = vmatprep.mubr.bf16.mxu0 %v1722_v36  ;;  %784 = vmatprep.mubr.bf16.mxu1 %v1724_v37 }
  0x57   : > { %721 = vmatmul.mubr.bf16.gmra.mrb[20].mxu0 %v1726_v38  ;;  %785 = vmatmul.mubr.bf16.gmra.mrb[20].mxu1 %v1727_v39 }
  0x58   : > { %728 = vmatprep.mubr.bf16.mxu0 %v1728_v40  ;;  %792 = vmatprep.mubr.bf16.mxu1 %v1730_v41 }
  0x5f   : > { %729 = vmatmul.mubr.bf16.gmra.mrb[24].mxu0 %v1732_v42  ;;  %793 = vmatmul.mubr.bf16.gmra.mrb[24].mxu1 %v1733_v43 }
  0x60   : > { %736 = vmatprep.mubr.bf16.mxu0 %v1734_v44  ;;  %800 = vmatprep.mubr.bf16.mxu1 %v1736_v45 }
  0x67   : > { %737 = vmatmul.mubr.bf16.gmra.mrb[28].mxu0 %v1738_v46  ;;  %801 = vmatmul.mubr.bf16.gmra.mrb[28].mxu1 %v1739_v47 }
 0x102   : > { %v1507_v48 = vpop.f32.mrb[0].mxu0  ;;  %v1555_v49 = vpop.f32.mrb[0].mxu1 }
 0x103   : > { %v1508_v50 = vpop.f32.mrb[1].mxu0  ;;  %v1556_v52 = vpop.f32.mrb[1].mxu1 }
 0x104   : > { %v1509_v53 = vadd.f32 %v1508_v50, %v1507_v48  ;;  %v1557_v54 = vadd.f32 %v1556_v52, %v1555_v49  ;;  %v1510_v55 = vpop.f32.mrb[2].mxu0  ;;  %v1558_v56 = vpop.f32.mrb[2].mxu1 }
 0x105   : > { %v1511_v57 = vpop.f32.mrb[3].mxu0  ;;  %v1559_v58 = vpop.f32.mrb[3].mxu1 }
 0x106   : > { %v915_v59 = vadd.f32 %v1509_v53, %v1987_v51  ;;  %v931_v60 = vadd.f32 %v1557_v54, %v1987_v51  ;;  %v1512_v61 = vadd.f32 %v1511_v57, %v1510_v55  ;;  %v1560_v62 = vadd.f32 %v1559_v58, %v1558_v56 }
 0x108   : > { %v916_v63 = vadd.f32 %v1512_v61, %v1987_v51  ;;  %v932_v0 = vadd.f32 %v1560_v62, %v1987_v51  ;;  %v947_v1 = vmax.f32 %v915_v59, 0.0  ;;  %v963_v2 = vmax.f32 %v931_v60, 0.0 }
 0x10a   : > { %v948_v3 = vmax.f32 %v916_v63, 0.0  ;;  %v964_v4 = vmax.f32 %v932_v0, 0.0  ;;  %v1513_v5 = vpop.f32.mrb[4].mxu0  ;;  %v1561_v6 = vpop.f32.mrb[4].mxu1 }
 0x10b   : > { %v1514_v7 = vpop.f32.mrb[5].mxu0  ;;  %v1562_v8 = vpop.f32.mrb[5].mxu1 }
 0x10c   : > { %v1399_v9 = vpack.c.bf16 %v948_v3, %v947_v1  ;;  %v1439_v10 = vpack.c.bf16 %v964_v4, %v963_v2  ;;  %v1515_v11 = vadd.f32 %v1514_v7, %v1513_v5  ;;  %v1563_v12 = vadd.f32 %v1562_v8, %v1561_v6  ;;  %v1516_v13 = vpop.f32.mrb[6].mxu0  ;;  %v1564_v14 = vpop.f32.mrb[6].mxu1 }
 0x10d   : > { %v1517_v15 = vpop.f32.mrb[7].mxu0  ;;  %v1565_v16 = vpop.f32.mrb[7].mxu1 }
 0x10e   : > { %1400 = vst [vmem:[%s1996_s7] sm:$0xff] %v1399_v9   ;;  %1483 = vst [vmem:[%s1996_s7 + $0x40] sm:$0xff] %v1439_v10   ;;  %v917_v17 = vadd.f32 %v1515_v11, %v1987_v51  ;;  %v933_v18 = vadd.f32 %v1563_v12, %v1987_v51  ;;  %v1518_v19 = vadd.f32 %v1517_v15, %v1516_v13 }
 0x10f   : > { %v1566_v20 = vadd.f32 %v1565_v16, %v1564_v14 }
 0x110   : > { %v918_v21 = vadd.f32 %v1518_v19, %v1987_v51  ;;  %v949_v23 = vmax.f32 %v917_v17, 0.0  ;;  %v965_v24 = vmax.f32 %v933_v18, 0.0 }
 0x111   : > { %v934_v22 = vadd.f32 %v1566_v20, %v1987_v51 }
 0x112   : > { %v950_v25 = vmax.f32 %v918_v21, 0.0  ;;  %v1519_v27 = vpop.f32.mrb[8].mxu0  ;;  %v1567_v28 = vpop.f32.mrb[8].mxu1 }
 0x113   : > { %v966_v26 = vmax.f32 %v934_v22, 0.0  ;;  %v1520_v29 = vpop.f32.mrb[9].mxu0  ;;  %v1568_v30 = vpop.f32.mrb[9].mxu1 }
 0x114   : > { %v1404_v31 = vpack.c.bf16 %v950_v25, %v949_v23  ;;  %v1521_v33 = vadd.f32 %v1520_v29, %v1519_v27  ;;  %v1569_v34 = vadd.f32 %v1568_v30, %v1567_v28  ;;  %v1522_v35 = vpop.f32.mrb[10].mxu0  ;;  %v1570_v36 = vpop.f32.mrb[10].mxu1 }
 0x115   : > { %v1444_v32 = vpack.c.bf16 %v966_v26, %v965_v24  ;;  %v1523_v37 = vpop.f32.mrb[11].mxu0  ;;  %v1571_v38 = vpop.f32.mrb[11].mxu1 }
 0x116   : > { %1476 = vst [vmem:[%s1996_s7 + $0x8] sm:$0xff] %v1404_v31   ;;  %v919_v39 = vadd.f32 %v1521_v33, %v1987_v51  ;;  %v935_v40 = vadd.f32 %v1569_v34, %v1987_v51  ;;  %v1524_v41 = vadd.f32 %v1523_v37, %v1522_v35  ;;  %v1572_v42 = vadd.f32 %v1571_v38, %v1570_v36 }
 0x117   : > { %1484 = vst [vmem:[%s1996_s7 + $0x48] sm:$0xff] %v1444_v32  }
 0x118   : > { %v920_v43 = vadd.f32 %v1524_v41, %v1987_v51  ;;  %v936_v44 = vadd.f32 %v1572_v42, %v1987_v51  ;;  %v951_v45 = vmax.f32 %v919_v39, 0.0  ;;  %v967_v46 = vmax.f32 %v935_v40, 0.0 }
 0x11a   : > { %v952_v47 = vmax.f32 %v920_v43, 0.0  ;;  %v968_v48 = vmax.f32 %v936_v44, 0.0  ;;  %v1525_v49 = vpop.f32.mrb[12].mxu0  ;;  %v1573_v50 = vpop.f32.mrb[12].mxu1 }
 0x11b   : > { %v1526_v52 = vpop.f32.mrb[13].mxu0  ;;  %v1574_v53 = vpop.f32.mrb[13].mxu1 }
 0x11c   : > { %v1409_v54 = vpack.c.bf16 %v952_v47, %v951_v45  ;;  %v1449_v55 = vpack.c.bf16 %v968_v48, %v967_v46  ;;  %v1527_v56 = vadd.f32 %v1526_v52, %v1525_v49  ;;  %v1575_v57 = vadd.f32 %v1574_v53, %v1573_v50  ;;  %v1528_v58 = vpop.f32.mrb[14].mxu0  ;;  %v1576_v59 = vpop.f32.mrb[14].mxu1 }
 0x11d   : > { %v1529_v60 = vpop.f32.mrb[15].mxu0  ;;  %v1577_v61 = vpop.f32.mrb[15].mxu1 }
 0x11e   : > { %1477 = vst [vmem:[%s1996_s7 + $0x10] sm:$0xff] %v1409_v54   ;;  %1485 = vst [vmem:[%s1996_s7 + $0x50] sm:$0xff] %v1449_v55   ;;  %v921_v62 = vadd.f32 %v1527_v56, %v1987_v51  ;;  %v937_v63 = vadd.f32 %v1575_v57, %v1987_v51  ;;  %v1530_v0 = vadd.f32 %v1529_v60, %v1528_v58 }
 0x11f   : > { %v1578_v1 = vadd.f32 %v1577_v61, %v1576_v59 }
 0x120   : > { %v922_v2 = vadd.f32 %v1530_v0, %v1987_v51  ;;  %v953_v4 = vmax.f32 %v921_v62, 0.0  ;;  %v969_v5 = vmax.f32 %v937_v63, 0.0 }
 0x121   : > { %v938_v3 = vadd.f32 %v1578_v1, %v1987_v51 }
 0x122   : > { %v954_v6 = vmax.f32 %v922_v2, 0.0  ;;  %v1531_v8 = vpop.f32.mrb[16].mxu0  ;;  %v1579_v9 = vpop.f32.mrb[16].mxu1 }
 0x123   : > { %v970_v7 = vmax.f32 %v938_v3, 0.0  ;;  %v1532_v10 = vpop.f32.mrb[17].mxu0  ;;  %v1580_v11 = vpop.f32.mrb[17].mxu1 }
 0x124   : > { %v1414_v12 = vpack.c.bf16 %v954_v6, %v953_v4  ;;  %v1533_v14 = vadd.f32 %v1532_v10, %v1531_v8  ;;  %v1581_v15 = vadd.f32 %v1580_v11, %v1579_v9  ;;  %v1534_v16 = vpop.f32.mrb[18].mxu0  ;;  %v1582_v17 = vpop.f32.mrb[18].mxu1 }
 0x125   : > { %v1454_v13 = vpack.c.bf16 %v970_v7, %v969_v5  ;;  %v1535_v18 = vpop.f32.mrb[19].mxu0  ;;  %v1583_v19 = vpop.f32.mrb[19].mxu1 }
 0x126   : > { %1478 = vst [vmem:[%s1996_s7 + $0x18] sm:$0xff] %v1414_v12   ;;  %v923_v20 = vadd.f32 %v1533_v14, %v1987_v51  ;;  %v939_v21 = vadd.f32 %v1581_v15, %v1987_v51  ;;  %v1536_v22 = vadd.f32 %v1535_v18, %v1534_v16  ;;  %v1584_v23 = vadd.f32 %v1583_v19, %v1582_v17 }
 0x127   : > { %1486 = vst [vmem:[%s1996_s7 + $0x58] sm:$0xff] %v1454_v13  }
 0x128   : > { %v924_v24 = vadd.f32 %v1536_v22, %v1987_v51  ;;  %v940_v25 = vadd.f32 %v1584_v23, %v1987_v51  ;;  %v955_v26 = vmax.f32 %v923_v20, 0.0  ;;  %v971_v27 = vmax.f32 %v939_v21, 0.0 }
 0x12a   : > { %v956_v28 = vmax.f32 %v924_v24, 0.0  ;;  %v972_v29 = vmax.f32 %v940_v25, 0.0  ;;  %v1537_v30 = vpop.f32.mrb[20].mxu0  ;;  %v1585_v31 = vpop.f32.mrb[20].mxu1 }
 0x12b   : > { %v1538_v32 = vpop.f32.mrb[21].mxu0  ;;  %v1586_v33 = vpop.f32.mrb[21].mxu1 }
 0x12c   : > { %v1419_v34 = vpack.c.bf16 %v956_v28, %v955_v26  ;;  %v1459_v35 = vpack.c.bf16 %v972_v29, %v971_v27  ;;  %v1539_v36 = vadd.f32 %v1538_v32, %v1537_v30  ;;  %v1587_v37 = vadd.f32 %v1586_v33, %v1585_v31  ;;  %v1540_v38 = vpop.f32.mrb[22].mxu0  ;;  %v1588_v39 = vpop.f32.mrb[22].mxu1 }
 0x12d   : > { %v1541_v40 = vpop.f32.mrb[23].mxu0  ;;  %v1589_v41 = vpop.f32.mrb[23].mxu1 }
 0x12e   : > { %1479 = vst [vmem:[%s1996_s7 + $0x20] sm:$0xff] %v1419_v34   ;;  %1487 = vst [vmem:[%s1996_s7 + $0x60] sm:$0xff] %v1459_v35   ;;  %v925_v42 = vadd.f32 %v1539_v36, %v1987_v51  ;;  %v941_v43 = vadd.f32 %v1587_v37, %v1987_v51  ;;  %v1542_v44 = vadd.f32 %v1541_v40, %v1540_v38 }
 0x12f   : > { %v1590_v45 = vadd.f32 %v1589_v41, %v1588_v39 }
 0x130   : > { %v926_v46 = vadd.f32 %v1542_v44, %v1987_v51  ;;  %v957_v48 = vmax.f32 %v925_v42, 0.0  ;;  %v973_v49 = vmax.f32 %v941_v43, 0.0 }
 0x131   : > { %v942_v47 = vadd.f32 %v1590_v45, %v1987_v51 }
 0x132   : > { %v958_v50 = vmax.f32 %v926_v46, 0.0  ;;  %v1543_v53 = vpop.f32.mrb[24].mxu0  ;;  %v1591_v54 = vpop.f32.mrb[24].mxu1 }
 0x133   : > { %v974_v52 = vmax.f32 %v942_v47, 0.0  ;;  %v1544_v55 = vpop.f32.mrb[25].mxu0  ;;  %v1592_v56 = vpop.f32.mrb[25].mxu1 }
 0x134   : > { %v1424_v57 = vpack.c.bf16 %v958_v50, %v957_v48  ;;  %v1545_v59 = vadd.f32 %v1544_v55, %v1543_v53  ;;  %v1593_v60 = vadd.f32 %v1592_v56, %v1591_v54  ;;  %v1546_v61 = vpop.f32.mrb[26].mxu0  ;;  %v1594_v62 = vpop.f32.mrb[26].mxu1 }
 0x135   : > { %v1464_v58 = vpack.c.bf16 %v974_v52, %v973_v49  ;;  %v1547_v63 = vpop.f32.mrb[27].mxu0  ;;  %v1595_v0 = vpop.f32.mrb[27].mxu1 }
 0x136   : > { %1480 = vst [vmem:[%s1996_s7 + $0x28] sm:$0xff] %v1424_v57   ;;  %v927_v1 = vadd.f32 %v1545_v59, %v1987_v51  ;;  %v943_v2 = vadd.f32 %v1593_v60, %v1987_v51  ;;  %v1548_v3 = vadd.f32 %v1547_v63, %v1546_v61  ;;  %v1596_v4 = vadd.f32 %v1595_v0, %v1594_v62 }
 0x137   : > { %1488 = vst [vmem:[%s1996_s7 + $0x68] sm:$0xff] %v1464_v58  }
 0x138   : > { %v928_v5 = vadd.f32 %v1548_v3, %v1987_v51  ;;  %v944_v6 = vadd.f32 %v1596_v4, %v1987_v51  ;;  %v959_v7 = vmax.f32 %v927_v1, 0.0  ;;  %v975_v8 = vmax.f32 %v943_v2, 0.0 }
 0x13a   : > { %v960_v9 = vmax.f32 %v928_v5, 0.0  ;;  %v976_v10 = vmax.f32 %v944_v6, 0.0  ;;  %v1549_v11 = vpop.f32.mrb[28].mxu0  ;;  %v1597_v12 = vpop.f32.mrb[28].mxu1 }
 0x13b   : > { %v1550_v13 = vpop.f32.mrb[29].mxu0  ;;  %v1598_v14 = vpop.f32.mrb[29].mxu1 }
 0x13c   : > { %v1429_v15 = vpack.c.bf16 %v960_v9, %v959_v7  ;;  %v1469_v16 = vpack.c.bf16 %v976_v10, %v975_v8  ;;  %v1551_v17 = vadd.f32 %v1550_v13, %v1549_v11  ;;  %v1599_v18 = vadd.f32 %v1598_v14, %v1597_v12  ;;  %v1552_v19 = vpop.f32.mrb[30].mxu0  ;;  %v1600_v20 = vpop.f32.mrb[30].mxu1 }
 0x13d   : > { %v1553_v21 = vpop.f32.mrb[31].mxu0  ;;  %v1601_v22 = vpop.f32.mrb[31].mxu1 }
 0x13e   : > { %1481 = vst [vmem:[%s1996_s7 + $0x30] sm:$0xff] %v1429_v15   ;;  %1489 = vst [vmem:[%s1996_s7 + $0x70] sm:$0xff] %v1469_v16   ;;  %v929_v23 = vadd.f32 %v1551_v17, %v1987_v51  ;;  %v945_v24 = vadd.f32 %v1599_v18, %v1987_v51  ;;  %v1554_v25 = vadd.f32 %v1553_v21, %v1552_v19 }
 0x13f   : > { %v1602_v26 = vadd.f32 %v1601_v22, %v1600_v20 }
 0x140   : > { %v930_v27 = vadd.f32 %v1554_v25, %v1987_v51  ;;  %v961_v29 = vmax.f32 %v929_v23, 0.0  ;;  %v977_v30 = vmax.f32 %v945_v24, 0.0 }
 0x141   : > { %v946_v28 = vadd.f32 %v1602_v26, %v1987_v51 }
 0x142   : > { %v962_v31 = vmax.f32 %v930_v27, 0.0 }
 0x143   : > { %v978_v32 = vmax.f32 %v946_v28, 0.0 }
 0x144   : > { %v1434_v33 = vpack.c.bf16 %v962_v31, %v961_v29 }
 0x145   : > { %v1474_v34 = vpack.c.bf16 %v978_v32, %v977_v30 }
 0x146   : > { %1482 = vst [vmem:[%s1996_s7 + $0x38] sm:$0xff] %v1434_v33  }
 0x147   : > { %1490 = vst [vmem:[%s1996_s7 + $0x78] sm:$0xff] %v1474_v34  }
 0x148   : > { %1753 = shalt.err (!%p1750_p5)
}
 0x149   : > { %s1754_s26 = scalar_lea.hbm %s2045_s11, 2048  ;;  %s1758_s30 = scalar_lea.hbm %s2102_s3, 16384 }
 0x14a   : > { %p1755_p6 = scmp.ne.s32.totalorder %s2045_s11, %s1754_s26  ;;  %p1759_p10 = scmp.lt.u32.totalorder %s2045_s11, %s2102_s3 }
 0x14b   : > { %p1760_p11 = scmp.lt.u32.totalorder %s1758_s30, %s1754_s26  ;;  %p1762_p13 = scmp.lt.u32.totalorder %s1754_s26, %s2045_s11 }
 0x14c   : > { %p1756_p7 = pnand %p1755_p6, %p1883_p4 }
 0x14d   : > { %p1761_p12 = por %p1760_p11, %p1759_p10 }
 0x14e   : > { %p1757_p9 = pneg %p1756_p7 }
 0x14f   : > { %p1763_p0 = por %p1762_p13, %p1761_p12 }
 0x151   : > { %p1764_p1 = pnand %p1763_p0, %p1757_p9 }
 0x153   : > { %1767 = shalt.err (!%p1764_p1)
}
 0x154   : > { %s1821_s5 = smov 64   ;;  %s1822_s7 = smov 4  }
 0x155   : > { %1619 = dma.vmem_to_hbm [thread:$0]  (%p1883_p4), %s2047_s8, 2048, %s2045_s11, %s2053_s15, %s1821_s5, %s1821_s5, %s1822_s7  }
 0x156 PF: > { %p1625_p2 = scmp.ge.s32.totalorder %s1818_s17, 2  ;;  %s1169_s28 = sand.u32 1, %s1798_s12  }
 0x157   : > { %s1170_s9 = scalar_lea.sflag [#allocation4], %s1169_s28 }
 0x158   : > { %p1622_p3 = pnand %p1625_p2, %p1890_p8 }
 0x15a   : > { %1793 = dma.done.wait (!%p1622_p3), %s1170_s9, 2048  }
 0x15b   : > { %1795 = vsyncadd (!%p1622_p3), %s1170_s9, 4294965248  ;;  %s16_s17 = sadd.s32 1, %s1818_s17   ;;  %s2105_s12 = smov %s1802_s13 }
 0x15c   : > { %p13_p5 = scmp.ge.s32.totalorder %s16_s17, 10   ;;  %s2106_s13 = smov %s1806_s14 }
 0x15d   : > { %s2107_s14 = smov %s1896_s25  ;;  %s2108_s15 = smov %s1814_s16 }
 0x15e   : > { %s2109_s16 = smov %s2111_s20  ;;  %15 = sbr.rel (!%p13_p5) target bundleno = 4 (0x4), region = 81 }
 0x165   :  { %1175 = vsyncpa [#allocation4], 1 }
 0x166   :  { %1177 = vsyncpa [#allocation4 + $0x1], 1 }

</bundles_post_ra>
